<compile_context>
chip_gen: v5e
topology: v5e:2x2
jax: 0.10.0
libtpu: 0.0.40
codegen_flags: <defaults>
</compile_context>

<pallas_src>
import math

import jax
import jax.numpy as jnp
from jax.experimental import pallas as pl
from jax.experimental.pallas import tpu as pltpu


def _cdiv(a: int, b: int) -> int:
    return -(-a // b)


def _round_up(a: int, m: int) -> int:
    return _cdiv(a, m) * m


def _mul_kernel(x_ref, f_ref, o_ref):
    # x_ref: (block_rows, lanes) tile; f_ref: (1, lanes) per-lane gain row.
    o_ref[...] = x_ref[...] * f_ref[...]


def _vmem_capacity_bytes() -> int:
    """Physical VMEM per TensorCore; conservative fallback if query fails."""
    try:
        return int(pltpu.get_tpu_info().vmem_capacity_bytes)
    except Exception:
        return 64 << 20  # v7x per-TC VMEM (smallest of the three generations)


def _launch(x2d: jax.Array, f_row: jax.Array, tile_rows: int,
            donate_input: bool) -> jax.Array:
    """Elementwise multiply kernel on a lane-dense (rows, L) view, L % 128 == 0."""
    rows, lanes = x2d.shape
    itemsize = x2d.dtype.itemsize
    row_bytes = lanes * itemsize

    # Dtype-dependent sublane multiple: 8 (f32), 16 (bf16/f16), 32 (int8/fp8).
    sub = 8 * max(1, 4 // itemsize)

    # Hardware-derived VMEM budget for the pipelined working set
    # (2x in-block + 2x out-block + filter row + slack), capped at ~48 MiB so it
    # fits v7x's 64 MiB per-TC VMEM with headroom.
    capacity = _vmem_capacity_bytes()
    budget = min((capacity * 3) // 4, 48 << 20)
    max_block_rows = max(sub, ((budget // 4) // row_bytes) // sub * sub)

    block_rows = min(int(tile_rows), max_block_rows)
    if rows >= 2 * sub:
        # Aim for >= 4 grid steps (>= 2 minimum): shards work across both v7x
        # TensorCores and preserves DMA/compute/writeback overlap everywhere.
        quarter = _round_up(_cdiv(rows, 4), sub)
        block_rows = min(block_rows, quarter)
        block_rows = max(sub, (block_rows // sub) * sub)
        if block_rows >= rows:
            block_rows = rows
    else:
        block_rows = rows  # tiny input: single full-extent block (always legal)

    block_bytes = block_rows * row_bytes
    vmem_limit = 4 * block_bytes + row_bytes + (4 << 20)
    vmem_limit = int(min(max(vmem_limit, 32 << 20), capacity))

    grid = (_cdiv(rows, block_rows),)

    extra = {}
    if donate_input:
        # Avoids allocating a second full-size HBM array when the caller
        # donates the input (bandwidth unchanged: still one read + one write).
        extra["input_output_aliases"] = {0: 0}

    return pl.pallas_call(
        _mul_kernel,
        out_shape=jax.ShapeDtypeStruct((rows, lanes), x2d.dtype),
        grid_spec=pltpu.PrefetchScalarGridSpec(
            num_scalar_prefetch=0,
            grid=grid,
            in_specs=[
                pl.BlockSpec((block_rows, lanes), lambda i: (i, 0)),
                pl.BlockSpec((1, lanes), lambda i: (0, 0)),
            ],
            out_specs=pl.BlockSpec((block_rows, lanes), lambda i: (i, 0)),
        ),
        compiler_params=pltpu.CompilerParams(
            dimension_semantics=("parallel",),
            vmem_limit_bytes=vmem_limit,
        ),
        **extra,
    )(x2d, f_row)


def optical_filter(
    spectral_radiance: jax.Array,
    filt: jax.Array,
    *,
    tile_rows: int = 512,           # ~7.75 MiB f32 block at L = lcm(31,128) = 3968
    min_pallas_bytes: int = 1 << 15,
    force_pallas: bool = False,
    donate_input: bool = False,
) -> jax.Array:
    """Apply per-channel spectral filter: x * filt (broadcast over last dim).

    NOTE: when this op sits inside a larger XLA graph, prefer the default
    (force_pallas=False for small inputs, or just `x * filt`) so XLA can fuse
    the multiply into its producer/consumer -- a standalone HBM-bound multiply
    can at best tie the fused version.
    """
    orig_shape = spectral_radiance.shape
    C = orig_shape[-1]
    assert filt.shape == (C,), f"filter must have shape ({C},), got {filt.shape}"

    f = filt.astype(spectral_radiance.dtype)
    n_elems = math.prod(orig_shape)
    nbytes = n_elems * spectral_radiance.dtype.itemsize

    # Small-input fast path: pallas_call fixed overhead dominates.
    if not force_pallas and nbytes < min_pallas_bytes:
        return spectral_radiance * f

    # Lane-dense layout: L = lcm(C, 128) channel-values per row so the kernel's
    # last dim is a multiple of 128 (unmasked stores, full vregs).
    L = math.lcm(C, 128)
    n_bulk = (n_elems // L) * L
    if n_bulk == 0:
        # Whole tensor is smaller than one lane-dense row: plain XLA multiply.
        return spectral_radiance * f

    f_row = jnp.tile(f, L // C).reshape(1, L)            # channel order preserved
    x_flat = spectral_radiance.reshape(-1)               # free row-major flatten
    bulk = _launch(x_flat[:n_bulk].reshape(n_bulk // L, L), f_row,
                   tile_rows, donate_input)
    if n_bulk == n_elems:
        return bulk.reshape(orig_shape)

    # Tail (< L elements, always a whole number of channels since C | L and
    # C | n): negligible work, handled by the fused XLA multiply.
    tail = (x_flat[n_bulk:].reshape(-1, C) * f).reshape(-1)
    return jnp.concatenate([bulk.reshape(-1), tail]).reshape(orig_shape)


if __name__ == "__main__":
    key = jax.random.PRNGKey(0)
    k_x, k_f, k_x2, k_x3 = jax.random.split(key, 4)

    # Shapes consistent with the module: [B, H, W, C], C = num_channels.
    B, H, W, C = 2, 16, 16, 31
    spectral_radiance = jax.random.normal(k_x, (B, H, W, C), dtype=jnp.float32)

    # Deterministic parameter init (torch.rand(num_channels) -> uniform [0,1)).
    filt = jax.random.uniform(k_f, (C,), dtype=jnp.float32)

    # force_pallas=True only so this small demo actually exercises the kernel;
    # production callers should keep the default and let XLA fuse tiny inputs.
    out = optical_filter(spectral_radiance, filt, force_pallas=True)
    jax.block_until_ready(out)
    assert out.shape == (B, H, W, C)
    assert jnp.allclose(out, spectral_radiance * filt, atol=1e-6, rtol=1e-6)

    # Bulk + tail path: B*H*W = 200 is not a multiple of 128 -> one lane-dense
    # row (L = 3968 elements) through the kernel, 2232-element tail via XLA.
    x2 = jax.random.normal(k_x2, (1, 10, 20, C), dtype=jnp.float32)
    out2 = optical_filter(x2, filt, force_pallas=True)
    jax.block_until_ready(out2)
    assert jnp.allclose(out2, x2 * filt, atol=1e-6, rtol=1e-6)

    # Tiny input (< one lane-dense row): plain XLA multiply path.
    x3 = jax.random.normal(k_x3, (1, 2, 3, C), dtype=jnp.float32)
    out3 = optical_filter(x3, filt, force_pallas=True)
    jax.block_until_ready(out3)
    assert jnp.allclose(out3, x3 * filt, atol=1e-6, rtol=1e-6)

    print("KERNEL_OK")
</pallas_src>

<mosaic_0001>
module attributes {stable_mosaic.version = 11 : i64} {
  func.func @_mul_kernel(%arg0: i32, %arg1: memref<4x3968xf32, #tpu.memory_space<vmem>>, %arg2: memref<1x3968xf32, #tpu.memory_space<vmem>>, %arg3: memref<4x3968xf32, #tpu.memory_space<vmem>>) attributes {dimension_semantics = [#tpu.dimension_semantics<parallel>], iteration_bounds = array<i64: 1>, scalar_prefetch = 0 : i64, scratch_operands = 0 : i64, tpu.core_type = #tpu.core_type<tc>, window_params = [{transform_indices = @transform_0, window_bounds = array<i64: 4, 3968>}, {pipeline_mode = #tpu.pipeline_mode<synchronous>, transform_indices = @transform_1, window_bounds = array<i64: 1, 3968>}, {transform_indices = @transform_2, window_bounds = array<i64: 4, 3968>}]} {
    %c0 = arith.constant 0 : index
    %c0_0 = arith.constant 0 : index
    %0 = vector.load %arg1[%c0, %c0_0] : memref<4x3968xf32, #tpu.memory_space<vmem>>, vector<4x3968xf32>
    %c0_1 = arith.constant 0 : index
    %c0_2 = arith.constant 0 : index
    %1 = vector.load %arg2[%c0_1, %c0_2] : memref<1x3968xf32, #tpu.memory_space<vmem>>, vector<1x3968xf32>
    %2 = vector.broadcast %1 : vector<1x3968xf32> to vector<4x3968xf32>
    %3 = arith.mulf %0, %2 : vector<4x3968xf32>
    %c0_3 = arith.constant 0 : index
    %c0_4 = arith.constant 0 : index
    %4 = vector.load %arg3[%c0_3, %c0_4] : memref<4x3968xf32, #tpu.memory_space<vmem>>, vector<4x3968xf32>
    tpu.vector_store %arg3[%c0_3, %c0_4], %3 {strides = array<i32>} : memref<4x3968xf32, #tpu.memory_space<vmem>>, vector<4x3968xf32>,
    return
  }
  func.func @transform_0(%arg0: i32) -> (i32, i32) {
    %c0_i32 = arith.constant 0 : i32
    %c0_i32_0 = arith.constant 0 : i32
    return %arg0, %c0_i32 : i32, i32
  }
  func.func @transform_1(%arg0: i32) -> (i32, i32) {
    %c0_i32 = arith.constant 0 : i32
    %c0_i32_0 = arith.constant 0 : i32
    %c0_i32_1 = arith.constant 0 : i32
    return %c0_i32, %c0_i32_0 : i32, i32
  }
  func.func @transform_2(%arg0: i32) -> (i32, i32) {
    %c0_i32 = arith.constant 0 : i32
    %c0_i32_0 = arith.constant 0 : i32
    return %arg0, %c0_i32 : i32, i32
  }
}

</mosaic_0001>

<bundles_post_ra>
// kernel: tpu_custom_call.1
= control target key start
LH: loop header
LB: loop body
LE: loop exit
PB: predicated region body
PF: predicated region fallthrough
CT: control target
= control target key end

     0   :  { %7 = vsyncpa [#allocation3], 0  ;;  %s315_s0 = inlined_call_operand.hbm [shape: f32[4,3968], index: 0, kind: input, shape index: {}]   ;;  %s316_s1 = inlined_call_operand.hbm [shape: f32[1,3968], index: 1, kind: input, shape index: {}]   ;;  %s317_s2 = inlined_call_operand.hbm [shape: f32[4,3968], index: 2, kind: output, shape index: {}]  }
   0x1   :  { %8 = vsyncpa [#allocation6], 0 }
   0x2   :  { %9 = vsyncpa [#allocation4], 0  ;;  %s15_s11 = sshll.u32 %s315_s0, 4  ;;  %s273_s12 = smov [#allocation2]   ;;  %s16_s11 = int_to_ptr.hbm [resolvable:$true] %s15_s11 }
   0x3   :  { %s17_s13 = sshll.u32 %s273_s12, 4  ;;  %s26_s16 = sshll.u32 %s316_s1, 4  ;;  %s18_s13 = int_to_ptr.vmem [resolvable:$true] %s17_s13  ;;  %s27_s16 = int_to_ptr.hbm [resolvable:$true] %s26_s16 }
   0x4   :  { %20 = dma.hbm_to_vmem [thread:$0]  %s16_s11, 1984, %s18_s13, [#allocation3]  }
   0x5   :  { %s274_s17 = smov [#allocation5]  }
   0x6   :  { %s28_s18 = sshll.u32 %s274_s17, 4  ;;  %s29_s18 = int_to_ptr.vmem [resolvable:$true] %s28_s18 }
   0x7   :  { %31 = dma.hbm_to_vmem [thread:$0]  %s27_s16, 496, %s29_s18, [#allocation6]  }
   0x8   :  { %267 = dma.done.wait [#allocation3], 1984  }
   0x9   :  { %268 = vsyncadd [#allocation3], 4294965312 }
   0xa   :  { %269 = dma.done.wait [#allocation6], 496  }
   0xb   :  { %270 = vsyncadd [#allocation6], 4294966800  ;;  %v56_v0 = vld [vmem:[#allocation5] sm:$0xff]  ;;  %vm111_vm0 = vcmask 1043456   ;;  %v57_v9 = vld [vmem:[#allocation5 + $0x8] sm:$0xff]  ;;  %s275_s0 = smov [#allocation7]  }
   0xc   :  { %v64_v1 = vperm.slane %v56_v0, 0  ;;  %v65_v2 = vperm.slane %v56_v0, 1  ;;  %v66_v3 = vperm.slane %v56_v0, 2  ;;  %v67_v4 = vperm.slane %v56_v0, 3  ;;  %v40_v10 = vld [vmem:[#allocation2] sm:$0xff]  ;;  %v41_v12 = vld [vmem:[#allocation2 + $0x8] sm:$0xff] }
   0xd   :  { %v68_v5 = vperm.slane %v56_v0, 4  ;;  %v69_v6 = vperm.slane %v56_v0, 5  ;;  %v70_v7 = vperm.slane %v56_v0, 6  ;;  %v71_v8 = vperm.slane %v56_v0, 7  ;;  %v42_v16 = vld [vmem:[#allocation2 + $0x10] sm:$0xff]  ;;  %v43_v18 = vld [vmem:[#allocation2 + $0x18] sm:$0xff] }
   0xe   :  { %v96_v11 = vrot.slane %v65_v2, 4  ;;  %v97_v13 = vrot.slane %v67_v4, 4  ;;  %v72_v14 = vperm.slane %v57_v9, 0  ;;  %v73_v15 = vperm.slane %v57_v9, 1  ;;  %v44_v24 = vld [vmem:[#allocation2 + $0x20] sm:$0xff]  ;;  %v58_v31 = vld [vmem:[#allocation5 + $0x10] sm:$0xff] }
   0xf   :  { %v98_v17 = vrot.slane %v69_v6, 4  ;;  %v99_v19 = vrot.slane %v71_v8, 4  ;;  %v74_v20 = vperm.slane %v57_v9, 2  ;;  %v75_v21 = vperm.slane %v57_v9, 3  ;;  %v45_v35 = vld [vmem:[#allocation2 + $0x28] sm:$0xff]  ;;  %v46_v46 = vld [vmem:[#allocation2 + $0x30] sm:$0xff] }
  0x10   :  { %v112_v22 = vsel %vm111_vm0, %v64_v1, %v96_v11  ;;  %v113_v23 = vsel %vm111_vm0, %v66_v3, %v97_v13  ;;  %v100_v25 = vrot.slane %v73_v15, 4  ;;  %v76_v26 = vperm.slane %v57_v9, 4  ;;  %v47_v48 = vld [vmem:[#allocation2 + $0x38] sm:$0xff]  ;;  %v48_v51 = vld [vmem:[#allocation2 + $0x40] sm:$0xff]  ;;  %v49_v58 = vld [vmem:[#allocation2 + $0x48] sm:$0xff]  ;;  %s179_s1 = sshll.u32 %s275_s0, 4  ;;  %s180_s1 = int_to_ptr.vmem [resolvable:$true] %s179_s1 }
  0x11   :  { %v142_v27 = vmul.f32 %v112_v22, %v40_v10  ;;  %v143_v28 = vmul.f32 %v113_v23, %v41_v12  ;;  %v114_v29 = vsel %vm111_vm0, %v68_v5, %v98_v17  ;;  %v115_v30 = vsel %vm111_vm0, %v70_v7, %v99_v19  ;;  %v59_v61 = vld [vmem:[#allocation5 + $0x18] sm:$0xff]  ;;  %v53_v22 = vld [vmem:[#allocation2 + $0x68] sm:$0xff]  ;;  %s181_s21 = sshll.u32 %s317_s2, 4  ;;  %s182_s21 = int_to_ptr.hbm [resolvable:$true] %s181_s21 }
  0x12   :  { %v144_v32 = vmul.f32 %v114_v29, %v42_v16  ;;  %v145_v33 = vmul.f32 %v115_v30, %v43_v18  ;;  %v116_v34 = vsel %vm111_vm0, %v72_v14, %v100_v25  ;;  %v101_v36 = vrot.slane %v75_v21, 4  ;;  %v50_v1 = vld [vmem:[#allocation2 + $0x50] sm:$0xff]  ;;  %v51_v5 = vld [vmem:[#allocation2 + $0x58] sm:$0xff]  ;;  %v52_v18 = vld [vmem:[#allocation2 + $0x60] sm:$0xff] }
  0x13   :  { %158 = vst [vmem:[#allocation7] sm:$0xff] %v142_v27  ;;  %v146_v37 = vmul.f32 %v116_v34, %v44_v24  ;;  %v77_v38 = vperm.slane %v57_v9, 5  ;;  %v78_v39 = vperm.slane %v57_v9, 6  ;;  %v79_v40 = vperm.slane %v57_v9, 7  ;;  %v55_v16 = vld [vmem:[#allocation2 + $0x78] sm:$0xf] }
  0x14   :  { %159 = vst [vmem:[#allocation7 + $0x8] sm:$0xff] %v143_v28  ;;  %v117_v41 = vsel %vm111_vm0, %v74_v20, %v101_v36  ;;  %v80_v42 = vperm.slane %v58_v31, 0  ;;  %v81_v43 = vperm.slane %v58_v31, 1  ;;  %v82_v44 = vperm.slane %v58_v31, 2  ;;  %v54_v25 = vld [vmem:[#allocation2 + $0x70] sm:$0xff] }
  0x15   :  { %160 = vst [vmem:[#allocation7 + $0x10] sm:$0xff] %v144_v32  ;;  %v147_v45 = vmul.f32 %v117_v41, %v45_v35  ;;  %v102_v47 = vrot.slane %v77_v38, 4  ;;  %v103_v49 = vrot.slane %v79_v40, 4  ;;  %v83_v50 = vperm.slane %v58_v31, 3 }
  0x16   :  { %161 = vst [vmem:[#allocation7 + $0x18] sm:$0xff] %v145_v33  ;;  %v104_v52 = vrot.slane %v81_v43, 4  ;;  %v84_v53 = vperm.slane %v58_v31, 4  ;;  %v85_v54 = vperm.slane %v58_v31, 5  ;;  %v86_v55 = vperm.slane %v58_v31, 6 }
  0x17   :  { %162 = vst [vmem:[#allocation7 + $0x20] sm:$0xff] %v146_v37  ;;  %v118_v56 = vsel %vm111_vm0, %v76_v26, %v102_v47  ;;  %v119_v57 = vsel %vm111_vm0, %v78_v39, %v103_v49  ;;  %v105_v59 = vrot.slane %v83_v50, 4  ;;  %v87_v60 = vperm.slane %v58_v31, 7 }
  0x18   :  { %163 = vst [vmem:[#allocation7 + $0x28] sm:$0xff] %v147_v45  ;;  %v148_v62 = vmul.f32 %v118_v56, %v46_v46  ;;  %v149_v63 = vmul.f32 %v119_v57, %v47_v48  ;;  %v120_v0 = vsel %vm111_vm0, %v80_v42, %v104_v52  ;;  %v106_v2 = vrot.slane %v85_v54, 4 }
  0x19   :  { %v150_v3 = vmul.f32 %v120_v0, %v48_v51  ;;  %v121_v4 = vsel %vm111_vm0, %v82_v44, %v105_v59  ;;  %v107_v6 = vrot.slane %v87_v60, 4  ;;  %v88_v7 = vperm.slane %v59_v61, 0 }
  0x1a   :  { %164 = vst [vmem:[#allocation7 + $0x30] sm:$0xff] %v148_v62  ;;  %v151_v8 = vmul.f32 %v121_v4, %v49_v58  ;;  %v122_v9 = vsel %vm111_vm0, %v84_v53, %v106_v2  ;;  %v89_v10 = vperm.slane %v59_v61, 1  ;;  %v90_v11 = vperm.slane %v59_v61, 2 }
  0x1b   :  { %165 = vst [vmem:[#allocation7 + $0x38] sm:$0xff] %v149_v63  ;;  %v152_v12 = vmul.f32 %v122_v9, %v50_v1  ;;  %v123_v13 = vsel %vm111_vm0, %v86_v55, %v107_v6  ;;  %v91_v14 = vperm.slane %v59_v61, 3  ;;  %v92_v15 = vperm.slane %v59_v61, 4 }
  0x1c   :  { %166 = vst [vmem:[#allocation7 + $0x40] sm:$0xff] %v150_v3  ;;  %v153_v17 = vmul.f32 %v123_v13, %v51_v5  ;;  %v108_v19 = vrot.slane %v89_v10, 4  ;;  %v93_v20 = vperm.slane %v59_v61, 5  ;;  %v94_v21 = vperm.slane %v59_v61, 6 }
  0x1d   :  { %167 = vst [vmem:[#allocation7 + $0x48] sm:$0xff] %v151_v8  ;;  %v109_v23 = vrot.slane %v91_v14, 4 }
  0x1e   :  { %168 = vst [vmem:[#allocation7 + $0x50] sm:$0xff] %v152_v12  ;;  %v124_v24 = vsel %vm111_vm0, %v88_v7, %v108_v19  ;;  %v110_v26 = vrot.slane %v93_v20, 4  ;;  %v157_v27 = vmul.f32 %v94_v21, %v55_v16 }
  0x1f   :  { %169 = vst [vmem:[#allocation7 + $0x58] sm:$0xff] %v153_v17  ;;  %v154_v28 = vmul.f32 %v124_v24, %v52_v18  ;;  %v125_v29 = vsel %vm111_vm0, %v90_v11, %v109_v23 }
  0x20   :  { %v155_v30 = vmul.f32 %v125_v29, %v53_v22  ;;  %v126_v31 = vsel %vm111_vm0, %v92_v15, %v110_v26  ;;  %173 = vst [vmem:[#allocation7 + $0x78] sm:$0xf] %v157_v27 }
  0x21   :  { %170 = vst [vmem:[#allocation7 + $0x60] sm:$0xff] %v154_v28  ;;  %v156_v32 = vmul.f32 %v126_v31, %v54_v25 }
  0x22   :  { %171 = vst [vmem:[#allocation7 + $0x68] sm:$0xff] %v155_v30 }
  0x23   :  { %172 = vst [vmem:[#allocation7 + $0x70] sm:$0xff] %v156_v32 }
  0x24   :  { %184 = dma.vmem_to_hbm [thread:$0]  %s180_s1, 1984, %s182_s21, [#allocation4]  }
  0x25   :  { %271 = dma.done.wait [#allocation4], 1984  }
  0x26   :  { %272 = vsyncadd [#allocation4], 4294965312 }
  0x27   :  { %189 = vsyncpa [#allocation3], 1 }
  0x28   :  { %190 = vsyncpa [#allocation6], 1 }
  0x29   :  { %191 = vsyncpa [#allocation4], 1 }

</bundles_post_ra>
